<compile_context>
chip_gen: v6e
topology: v6e:2x2x1
jax: 0.10.0
libtpu: 0.0.40
codegen_flags: <defaults>
</compile_context>

<pallas_src>
import jax
import jax.numpy as jnp
from jax.experimental import pallas as pl
from jax.experimental.pallas import tpu as pltpu


def _expval_z_kernel(cos_ref, out_ref):
    """cos_ref: SMEM (2,) f32 = [cos(theta), cos(phi)].

    <Z> for RY(phi) RX(theta) |0> is exactly cos(theta)*cos(phi); one scalar
    multiply on the scalar unit.  No vregs, no VMEM, no VALU.
    """
    out_ref[0] = cos_ref[0] * cos_ref[1]


def _pallas_expval_z(cos_angles):
    return pl.pallas_call(
        _expval_z_kernel,
        out_shape=jax.ShapeDtypeStruct((1,), jnp.float32),
        in_specs=[pl.BlockSpec(memory_space=pltpu.MemorySpace.SMEM)],
        out_specs=pl.BlockSpec(memory_space=pltpu.MemorySpace.SMEM),
        cost_estimate=pl.CostEstimate(flops=1, transcendentals=0,
                                      bytes_accessed=12),
    )(cos_angles)


@jax.custom_vjp
def _expval_z(theta, phi):
    # One vectorized trig op over both gate angles, then the scalar kernel.
    cos_angles = jnp.cos(jnp.stack([theta, phi]).astype(jnp.float32))
    return _pallas_expval_z(cos_angles)


def _expval_z_fwd(theta, phi):
    return _expval_z(theta, phi), (theta, phi)


def _expval_z_bwd(res, g):
    theta, phi = res
    g0 = g[0]
    dtheta = (-jnp.sin(theta) * jnp.cos(phi)) * g0
    dphi = (-jnp.cos(theta) * jnp.sin(phi)) * g0
    return dtheta, dphi


_expval_z.defvjp(_expval_z_fwd, _expval_z_bwd)


@jax.jit
def optimization_model_forward(rx_param, ry_param):
    """Equivalent of OptimizationModel.forward(): returns <Z> with shape (1,)."""
    theta = jnp.asarray(rx_param, jnp.float32)
    phi = jnp.asarray(ry_param, jnp.float32)
    # expval_joint_analytical returns shape (bsz,) with bsz = 1
    return _expval_z(theta, phi)


if __name__ == "__main__":
    # Deterministic parameter init, matching the module's __init__:
    #   rx0 init_params = 0.011, ry0 init_params = 0.012
    rx_param = jnp.float32(0.011)
    ry_param = jnp.float32(0.012)

    result = optimization_model_forward(rx_param, ry_param)
    jax.block_until_ready(result)

    # Reference: analytically <Z> = cos(theta) * cos(phi)
    expected = jnp.cos(rx_param) * jnp.cos(ry_param)
    assert result.shape == (1,), result.shape
    assert jnp.allclose(result[0], expected, atol=1e-6), (result, expected)

    # Extra deterministic random-angle check (PRNGKey(0)) against closed form.
    key = jax.random.PRNGKey(0)
    k1, k2 = jax.random.split(key)
    th = jax.random.uniform(k1, (), jnp.float32, minval=-3.0, maxval=3.0)
    ph = jax.random.uniform(k2, (), jnp.float32, minval=-3.0, maxval=3.0)
    r2 = optimization_model_forward(th, ph)
    jax.block_until_ready(r2)
    assert jnp.allclose(r2[0], jnp.cos(th) * jnp.cos(ph), atol=1e-5), (r2,)

    # Trainability check: gradients through the custom_vjp match closed form.
    grads = jax.grad(lambda t, p: optimization_model_forward(t, p)[0],
                     argnums=(0, 1))(th, ph)
    jax.block_until_ready(grads)
    assert jnp.allclose(grads[0], -jnp.sin(th) * jnp.cos(ph), atol=1e-5), grads
    assert jnp.allclose(grads[1], -jnp.cos(th) * jnp.sin(ph), atol=1e-5), grads

    print("KERNEL_OK")
</pallas_src>

<mosaic_0001>
module attributes {stable_mosaic.version = 11 : i64} {
  func.func @_expval_z_kernel(%arg0: memref<2xf32, #tpu.memory_space<smem>>, %arg1: memref<1xf32, #tpu.memory_space<smem>>) attributes {dimension_semantics = [], scalar_prefetch = 0 : i64, scratch_operands = 0 : i64, tpu.core_type = #tpu.core_type<tc>} {
    %c0 = arith.constant 0 : index
    %0 = memref.load %arg0[%c0] : memref<2xf32, #tpu.memory_space<smem>>
    %c1 = arith.constant 1 : index
    %1 = memref.load %arg0[%c1] : memref<2xf32, #tpu.memory_space<smem>>
    %2 = arith.mulf %0, %1 : f32
    %c0_0 = arith.constant 0 : index
    %3 = memref.load %arg1[%c0_0] : memref<1xf32, #tpu.memory_space<smem>>
    memref.store %2, %arg1[%c0_0] : memref<1xf32, #tpu.memory_space<smem>>
    return
  }
}

</mosaic_0001>

<bundles_post_ra>
// kernel: optimization_model_forward.1
= control target key start
LH: loop header
LB: loop body
LE: loop exit
PB: predicated region body
PF: predicated region fallthrough
CT: control target
= control target key end

     0   :  { %6 = vsyncpa [#allocation4], 0  ;;  %s86_s0 = inlined_call_operand.vmem [shape: f32[2], index: 0, kind: input, shape index: {}]   ;;  %s87_s1 = inlined_call_operand.hbm [shape: f32[1], index: 1, kind: output, shape index: {}]  }
   0x1   :  { %7 = vsyncpa [#allocation3], 0  ;;  %s14_s8 = sshll.u32 %s86_s0, 4  ;;  %s15_s8 = int_to_ptr.vmem [resolvable:$true] %s14_s8 }
   0x2   :  { %s44_s9 = scalar_lea.vmem %s15_s8, 16  ;;  %p49_p1 = scmp.lt.s32.totalorder %s15_s8, %s15_s8 }
   0x3   :  { %p45_p0 = scmp.ne.s32.totalorder %s15_s8, %s44_s9  ;;  %p50_p2 = scmp.lt.s32.totalorder %s44_s9, %s44_s9 }
   0x5   :  { %p51_p3 = por %p50_p2, %p49_p1 }
   0x7   :  { %p52_p4 = pnand %p51_p3, %p45_p0 }
   0x9   :  { %55 = shalt.err (!%p52_p4)
}
   0xa   :  { %s68_s10 = smov [#allocation2]  }
   0xb   :  { %17 = dma.vmem_to_smem %s15_s8, 16, %s68_s10, [#allocation4]  }
   0xc   :  { %64 = dma.done.wait [#allocation4], 16  }
   0xd   :  { %65 = vsyncadd [#allocation4], 4294967280 }
   0xe   :  { %21 = sfence }
   0xf   :  { %s22_s11 = sld [smem:[#allocation2]]  ;;  %s69_s14 = smov [#allocation5]  }
  0x10   :  { %s41_s12 = sld [smem:[#allocation2 + $0x1]] }
  0x16   :  { %s24_s13 = smul.f32 %s41_s12, %s22_s11 }
  0x18   :  { %26 = sst [smem:[#allocation5]] %s24_s13 }
  0x19   :  { %34 = dma.smem_to_hbm %s69_s14, 16, %s87_s1, [#allocation3]  }
  0x1a   :  { %66 = dma.done.wait [#allocation3], 16  }
  0x1b   :  { %67 = vsyncadd [#allocation3], 4294967280 }
  0x1c   :  { %38 = sfence }
  0x1d   :  { %39 = vsyncpa [#allocation3], 1 }
  0x1e   :  { %40 = vsyncpa [#allocation4], 1 }

</bundles_post_ra>
